<compile_context>
chip_gen: v7x
topology: tpu7x:2x2x1
jax: 0.10.0
libtpu: 0.0.40
codegen_flags: <defaults>
</compile_context>

<pallas_src>
import jax
import jax.numpy as jnp
from jax.experimental import pallas as pl
from jax.experimental.pallas import tpu as pltpu

_LANES = 128                  # TPU lane width: lane-dense, unmasked vst
_MAX_TILE_ROWS = 16384        # 16384 * 128 * 4 B = 8 MiB per output tile
_SINGLE_BLOCK_ROWS = 4096     # <= 2 MiB -> one full-array block, 1-step grid
_MIN_GRID_STEPS = 4           # keep both v7x TensorCores busy on large fills
_VMEM_LIMIT_BYTES = 32 * 1024 * 1024  # fits 2x8 MiB double-buffered output


def _round_up(n, m):
    return -(-n // m) * m


def _fill_kernel(value_ref, o_ref):
    # value_ref: SMEM scalar parameter, shape (1,)
    # o_ref: VMEM output tile, shape (tile_rows, 128) -- lane-dense stores
    o_ref[...] = jnp.full(o_ref.shape, value_ref[0], dtype=o_ref.dtype)


def dummy_model_forward(x, value, n_vocab):
    """x: (B, T) int tokens; value: (1,) float32 parameter. Returns (B, T, n_vocab) f32."""
    B, T = x.shape
    V = n_vocab
    total = B * T * V

    # Flatten the output into a lane-dense (rows, 128) slab.
    rows = -(-total // _LANES)  # ceil-div

    if rows <= _SINGLE_BLOCK_ROWS:
        # Single block covering the whole (possibly non-(8,128)-divisible)
        # array: full-array blocks are exempt from the divisibility rule and a
        # 1-step grid has zero per-step overhead.
        tile_rows = rows
    else:
        # Large fill: up to 8 MiB tiles, but at least _MIN_GRID_STEPS grid
        # steps so the "parallel" axis can shard across v7x's two TensorCores.
        # tile_rows is a multiple of 8 so partial last blocks remain legal.
        tile_rows = min(_MAX_TILE_ROWS,
                        _round_up(-(-rows // _MIN_GRID_STEPS), 8))
    grid_steps = pl.cdiv(rows, tile_rows)  # Pallas clips the partial last block

    out2d = pl.pallas_call(
        _fill_kernel,
        out_shape=jax.ShapeDtypeStruct((rows, _LANES), jnp.float32),
        grid_spec=pltpu.PrefetchScalarGridSpec(
            num_scalar_prefetch=0,
            grid=(grid_steps,),
            in_specs=[
                # scalar parameter lives in SMEM, shared across all grid steps
                pl.BlockSpec(memory_space=pltpu.SMEM),
            ],
            out_specs=pl.BlockSpec((tile_rows, _LANES), lambda i: (i, 0)),
        ),
        compiler_params=pltpu.CompilerParams(
            dimension_semantics=("parallel",),
            vmem_limit_bytes=_VMEM_LIMIT_BYTES,
        ),
        cost_estimate=pl.CostEstimate(
            flops=0,
            transcendentals=0,
            bytes_accessed=rows * _LANES * 4,
        ),
    )(value)

    # Restore the (B, T, V) view.  When total % 128 == 0 this is a pure
    # metadata reshape (no copy); the tail slice only exists otherwise.
    flat = out2d.reshape(-1)
    if rows * _LANES != total:
        flat = flat[:total]
    return flat.reshape(B, T, V)


if __name__ == "__main__":
    key = jax.random.PRNGKey(0)

    n_vocab = 32
    B, T = 2, 8

    # Deterministic parameter init: matches nn.Parameter(torch.zeros(1)).
    value = jnp.zeros((1,), dtype=jnp.float32)

    # Deterministic example input: token ids (contents unused by forward).
    x = jax.random.randint(key, (B, T), 0, n_vocab, dtype=jnp.int32)

    out = jax.block_until_ready(dummy_model_forward(x, value, n_vocab))
    ref = jnp.broadcast_to(value.reshape(1, 1, 1), (B, T, n_vocab))
    assert out.shape == (B, T, n_vocab)
    assert out.dtype == jnp.float32
    assert bool(jnp.allclose(out, ref))

    # Non-zero parameter: confirms the broadcast-value path.
    value2 = jnp.array([3.25], dtype=jnp.float32)
    out2 = jax.block_until_ready(dummy_model_forward(x, value2, n_vocab))
    ref2 = jnp.broadcast_to(value2.reshape(1, 1, 1), (B, T, n_vocab))
    assert bool(jnp.allclose(out2, ref2))

    # Exercise the tiled (multi-step grid, partial last block) path.
    B3, T3, V3 = 3, 333, 2048   # rows = 15984 > _SINGLE_BLOCK_ROWS, grid = 4
    x3 = jax.random.randint(key, (B3, T3), 0, V3, dtype=jnp.int32)
    out3 = jax.block_until_ready(dummy_model_forward(x3, value2, V3))
    assert out3.shape == (B3, T3, V3)
    assert bool(jnp.allclose(out3, 3.25))

    print("KERNEL_OK")
</pallas_src>

<mosaic_0001>
module attributes {stable_mosaic.version = 11 : i64} {
  func.func @_fill_kernel(%arg0: i32, %arg1: memref<1xf32, #tpu.memory_space<smem>>, %arg2: memref<4x128xf32, #tpu.memory_space<vmem>>) attributes {dimension_semantics = [#tpu.dimension_semantics<parallel>], iteration_bounds = array<i64: 1>, scalar_prefetch = 0 : i64, scratch_operands = 0 : i64, tpu.core_type = #tpu.core_type<tc>, window_params = [{transform_indices = @transform_0, window_bounds = array<i64: 1>}, {transform_indices = @transform_1, window_bounds = array<i64: 4, 128>}]} {
    %c0 = arith.constant 0 : index
    %0 = memref.load %arg1[%c0] : memref<1xf32, #tpu.memory_space<smem>>
    %1 = vector.broadcast %0 : f32 to vector<4x128xf32>
    %c0_0 = arith.constant 0 : index
    %c0_1 = arith.constant 0 : index
    %2 = vector.load %arg2[%c0_0, %c0_1] : memref<4x128xf32, #tpu.memory_space<vmem>>, vector<4x128xf32>
    tpu.vector_store %arg2[%c0_0, %c0_1], %1 {strides = array<i32>} : memref<4x128xf32, #tpu.memory_space<vmem>>, vector<4x128xf32>,
    return
  }
  func.func @transform_0(%arg0: i32) -> i32 {
    %c0_i32 = arith.constant 0 : i32
    %c0_i32_0 = arith.constant 0 : i32
    return %c0_i32 : i32
  }
  func.func @transform_1(%arg0: i32) -> (i32, i32) {
    %c0_i32 = arith.constant 0 : i32
    %c0_i32_0 = arith.constant 0 : i32
    return %arg0, %c0_i32 : i32, i32
  }
}

</mosaic_0001>

<bundles_post_ra>
// kernel: tpu_custom_call.1
= control target key start
LH: loop header
LB: loop body
LE: loop exit
PB: predicated region body
PF: predicated region fallthrough
CT: control target
= control target key end

     0   :  { %s78_s0 = inlined_call_operand.<no memory space> [shape: f32[1], index: 0, kind: input, shape index: {}]   ;;  %s79_s1 = inlined_call_operand.hbm [shape: f32[4,128], index: 1, kind: output, shape index: {}]  }
   0x1   :  { %v11_v0 = vstv %s78_s0 }
   0x2   :  { %7 = vsyncpa [#allocation4], 0  ;;  %12 = vst [vmem:[#allocation3] sm:$0xf] %v11_v0  ;;  %s52_s8 = smov [#allocation3]  }
   0x3   :  { %s19_s9 = sshll.u32 %s52_s8, 4  ;;  %s20_s9 = int_to_ptr.vmem [resolvable:$true] %s19_s9 }
   0x4   :  { %s28_s10 = scalar_lea.vmem %s20_s9, 64  ;;  %p33_p1 = scmp.lt.s32.totalorder %s20_s9, %s20_s9 }
   0x5   :  { %p29_p0 = scmp.ne.s32.totalorder %s20_s9, %s28_s10  ;;  %p34_p2 = scmp.lt.s32.totalorder %s28_s10, %s28_s10 }
   0x7   :  { %p35_p3 = por %p34_p2, %p33_p1 }
   0x9   :  { %p36_p4 = pnand %p35_p3, %p29_p0 }
   0xb   :  { %39 = shalt.err (!%p36_p4)
}
   0xc   :  { %s40_s13 = scalar_lea.hbm %s79_s1, 64 }
   0xd   :  { %p41_p5 = scmp.ne.s32.totalorder %s79_s1, %s40_s13  ;;  %p44_p6 = scmp.lt.u32.totalorder %s40_s13, %s79_s1 }
   0xf   :  { %p46_p7 = pnand %p44_p6, %p41_p5 }
  0x11   :  { %49 = shalt.err (!%p46_p7)
}
  0x12   :  { %22 = dma.vmem_to_hbm [thread:$0]  %s20_s9, 64, %s79_s1, [#allocation4]  }
  0x13   :  { %50 = dma.done.wait [#allocation4], 64  }
  0x14   :  { %51 = vsyncadd [#allocation4], 4294967232 }
  0x15   :  { %26 = vsyncpa [#allocation4], 1 }

</bundles_post_ra>
